<compile_context>
chip_gen: v7x
topology: tpu7x:2x2x1
jax: 0.10.0
libtpu: 0.0.40
codegen_flags: <defaults>
</compile_context>

<pallas_src>
import functools
import math

import jax
import jax.numpy as jnp
from jax.experimental import pallas as pl
from jax.experimental.pallas import tpu as pltpu

_INV_SQRT2 = 1.0 / math.sqrt(2.0)


def _gelu(x):
    # exact (erf-based) GELU, matching the BERT-style gelu used in the module
    return 0.5 * x * (1.0 + jax.lax.erf(x * _INV_SQRT2))


def gcn_kernel(at_ref, x_ref, wcat_ref, w0_ref, gw1_ref, bw1_ref, o_ref,
               *, d_real, d_pad):
    At = at_ref[...]          # [Np, Np]    A pre-transposed (and zero-padded) in wrapper
    x = x_ref[...]            # [Np, Dp]
    Wcat = wcat_ref[...]      # [Dp, 2*Dp]  = [Wd | Wr]
    W0 = w0_ref[...]          # [Dp, Dp]    MLP layer 0
    gw1 = gw1_ref[...]        # [1, Dp]     = gamma * w1   (LN scale folded into head)
    bw1 = bw1_ref[...]        # [1, Dp]     = beta  * w1   (LN shift folded into head)

    def gcn_layer(xin):
        # single MXU matmul for both branches (lane-dense output), then slice
        dr = jnp.dot(xin, Wcat, preferred_element_type=jnp.float32)  # [Np, 2Dp]
        h = _gelu(dr[:, :d_pad])                  # diffusion branch
        diff = jnp.dot(At, h, preferred_element_type=jnp.float32)
        return _gelu(dr[:, d_pad:] + diff)        # retained branch + diffusion

    x1 = gcn_layer(x)
    x2 = gcn_layer(x1)

    # ---- MLP head: Linear(D,D) -> gelu -> LayerNorm(D) -> Linear(D,1) ----
    y = _gelu(jnp.dot(x2, W0, preferred_element_type=jnp.float32))   # [Np, Dp]

    # One-pass LayerNorm statistics over the real (unpadded) feature count;
    # padded lanes of y are exactly 0, so the sums only see real features.
    inv_d = 1.0 / d_real
    mu = jnp.sum(y, axis=-1, keepdims=True) * inv_d                  # [Np, 1]
    ex2 = jnp.sum(y * y, axis=-1, keepdims=True) * inv_d
    var = ex2 - mu * mu
    r = jax.lax.rsqrt(var + 1e-5)                                    # [Np, 1]

    # LayerNorm + final Linear(D,1), algebraically folded:
    #   sum(((y - mu)*r*gamma + beta) * w1)
    #     = r * (sum(y * gw1) - mu * sum(gw1)) + sum(bw1)
    s1 = jnp.sum(y * gw1, axis=-1, keepdims=True)                    # [Np, 1]
    sum_gw1 = jnp.sum(gw1, keepdims=True)                            # [1, 1]
    sum_bw1 = jnp.sum(bw1, keepdims=True)                            # [1, 1]
    o_ref[...] = r * (s1 - mu * sum_gw1) + sum_bw1                   # [Np, 1]


def gcn_forward(A, x, Wd, Wr, W0, W1, gamma, beta):
    N, D = x.shape
    Dp = ((D + 127) // 128) * 128          # pad feature dim to lane width
    Np = ((N + 7) // 8) * 8                # pad node dim to sublane width
    pad_d = Dp - D
    pad_n = Np - N

    # ---- wrapper-side layout plumbing (done once, outside the kernel) ----
    At = jnp.pad(A.T, ((0, pad_n), (0, pad_n)))             # [Np, Np]
    xp = jnp.pad(x, ((0, pad_n), (0, pad_d)))               # [Np, Dp]
    Wd_p = jnp.pad(Wd, ((0, pad_d), (0, pad_d)))
    Wr_p = jnp.pad(Wr, ((0, pad_d), (0, pad_d)))
    Wcat = jnp.concatenate([Wd_p, Wr_p], axis=1)            # [Dp, 2*Dp]
    W0_p = jnp.pad(W0, ((0, pad_d), (0, pad_d)))            # [Dp, Dp]
    w1row = jnp.pad(W1[:, 0][None, :], ((0, 0), (0, pad_d)))        # [1, Dp]
    gamma_p = jnp.pad(gamma.reshape(1, -1), ((0, 0), (0, pad_d)))   # [1, Dp]
    beta_p = jnp.pad(beta.reshape(1, -1), ((0, 0), (0, pad_d)))     # [1, Dp]
    gw1 = gamma_p * w1row                                   # LN scale folded into head
    bw1 = beta_p * w1row                                    # LN shift folded into head

    kernel = functools.partial(gcn_kernel, d_real=float(D), d_pad=Dp)

    out = pl.pallas_call(
        kernel,
        out_shape=jax.ShapeDtypeStruct((Np, 1), jnp.float32),
        in_specs=[pl.BlockSpec(memory_space=pltpu.MemorySpace.VMEM)] * 6,
        out_specs=pl.BlockSpec(memory_space=pltpu.MemorySpace.VMEM),
        compiler_params=pltpu.CompilerParams(vmem_limit_bytes=64 * 1024 * 1024),
    )(At, xp, Wcat, W0_p, gw1, bw1)
    # TODO(synk): at realistic N (A is N^2*4 B), switch to a tiled grid over row
    # blocks (multi-pass for the A.T @ h mixing) instead of full VMEM residency.
    return out[:N, 0]  # drop node padding, squeeze(-1)


if __name__ == "__main__":
    N, D = 8, 32  # N nodes, D = input_size

    key = jax.random.PRNGKey(0)
    k_a, k_x, k_wd, k_wr, k_w0, k_w1 = jax.random.split(key, 6)

    A = jax.random.normal(k_a, (N, N), dtype=jnp.float32)
    x = jax.random.normal(k_x, (N, D), dtype=jnp.float32)

    # Linear weights ~ Normal(0, 0.05), stored [in, out]; no biases.
    Wd = 0.05 * jax.random.normal(k_wd, (D, D), dtype=jnp.float32)
    Wr = 0.05 * jax.random.normal(k_wr, (D, D), dtype=jnp.float32)
    W0 = 0.05 * jax.random.normal(k_w0, (D, D), dtype=jnp.float32)
    W1 = 0.05 * jax.random.normal(k_w1, (D, 1), dtype=jnp.float32)

    # LayerNorm default init: gamma=1, beta=0
    gamma = jnp.ones((1, D), dtype=jnp.float32)
    beta = jnp.zeros((1, D), dtype=jnp.float32)

    out = gcn_forward(A, x, Wd, Wr, W0, W1, gamma, beta)
    jax.block_until_ready(out)

    # pure-JAX reference check
    def gelu(v):
        return 0.5 * v * (1.0 + jax.lax.erf(v / math.sqrt(2.0)))

    def ref(A, x):
        h = A.T @ gelu(x @ Wd)
        x1 = gelu(x @ Wr + h)
        h2 = A.T @ gelu(x1 @ Wd)
        x2 = gelu(x1 @ Wr + h2)
        y = gelu(x2 @ W0)
        mu = y.mean(-1, keepdims=True)
        var = ((y - mu) ** 2).mean(-1, keepdims=True)
        yn = (y - mu) / jnp.sqrt(var + 1e-5) * gamma + beta
        return (yn @ W1)[:, 0]

    expected = ref(A, x)
    assert out.shape == (N,)
    assert jnp.allclose(out, expected, atol=1e-4, rtol=1e-4)
    print("KERNEL_OK")
</pallas_src>

<mosaic_0001>
module attributes {stable_mosaic.version = 11 : i64} {
  func.func @gcn_kernel(%arg0: memref<8x8xf32, #tpu.memory_space<vmem>>, %arg1: memref<8x128xf32, #tpu.memory_space<vmem>>, %arg2: memref<128x256xf32, #tpu.memory_space<vmem>>, %arg3: memref<128x128xf32, #tpu.memory_space<vmem>>, %arg4: memref<1x128xf32, #tpu.memory_space<vmem>>, %arg5: memref<1x128xf32, #tpu.memory_space<vmem>>, %arg6: memref<8x1xf32, #tpu.memory_space<vmem>>) attributes {dimension_semantics = [], scalar_prefetch = 0 : i64, scratch_operands = 0 : i64, tpu.core_type = #tpu.core_type<tc>} {
    %c0 = arith.constant 0 : index
    %c0_0 = arith.constant 0 : index
    %0 = vector.load %arg0[%c0, %c0_0] : memref<8x8xf32, #tpu.memory_space<vmem>>, vector<8x8xf32>
    %c0_1 = arith.constant 0 : index
    %c0_2 = arith.constant 0 : index
    %1 = vector.load %arg1[%c0_1, %c0_2] : memref<8x128xf32, #tpu.memory_space<vmem>>, vector<8x128xf32>
    %c0_3 = arith.constant 0 : index
    %c0_4 = arith.constant 0 : index
    %2 = vector.load %arg2[%c0_3, %c0_4] : memref<128x256xf32, #tpu.memory_space<vmem>>, vector<128x256xf32>
    %c0_5 = arith.constant 0 : index
    %c0_6 = arith.constant 0 : index
    %3 = vector.load %arg3[%c0_5, %c0_6] : memref<128x128xf32, #tpu.memory_space<vmem>>, vector<128x128xf32>
    %c0_7 = arith.constant 0 : index
    %c0_8 = arith.constant 0 : index
    %4 = vector.load %arg4[%c0_7, %c0_8] : memref<1x128xf32, #tpu.memory_space<vmem>>, vector<1x128xf32>
    %c0_9 = arith.constant 0 : index
    %c0_10 = arith.constant 0 : index
    %5 = vector.load %arg5[%c0_9, %c0_10] : memref<1x128xf32, #tpu.memory_space<vmem>>, vector<1x128xf32>
    %cst = arith.constant dense<0.000000e+00> : vector<8x256xf32>
    %6 = tpu.matmul %1, %2, %cst {dimension_numbers = #tpu.dot_dimension_numbers<[1], [0], [0], [1], [0, 0, 1, 1], [], []>} : vector<8x128xf32>, vector<128x256xf32>, vector<8x256xf32> -> vector<8x256xf32>
    %7 = vector.extract_strided_slice %6 {offsets = [0, 0], sizes = [8, 128], strides = [1, 1]} : vector<8x256xf32> to vector<8x128xf32>
    %cst_11 = arith.constant 5.000000e-01 : f32
    %8 = vector.broadcast %cst_11 : f32 to vector<8x128xf32>
    %9 = arith.mulf %8, %7 : vector<8x128xf32>
    %cst_12 = arith.constant 0.707106769 : f32
    %10 = vector.broadcast %cst_12 : f32 to vector<8x128xf32>
    %11 = arith.mulf %7, %10 : vector<8x128xf32>
    %12 = math.erf %11 : vector<8x128xf32>
    %cst_13 = arith.constant 1.000000e+00 : f32
    %13 = vector.broadcast %cst_13 : f32 to vector<8x128xf32>
    %14 = arith.addf %13, %12 : vector<8x128xf32>
    %15 = arith.mulf %9, %14 : vector<8x128xf32>
    %cst_14 = arith.constant dense<0.000000e+00> : vector<8x128xf32>
    %16 = tpu.matmul %0, %15, %cst_14 {dimension_numbers = #tpu.dot_dimension_numbers<[1], [0], [0], [1], [0, 0, 1, 1], [], []>} : vector<8x8xf32>, vector<8x128xf32>, vector<8x128xf32> -> vector<8x128xf32>
    %17 = vector.extract_strided_slice %6 {offsets = [0, 128], sizes = [8, 128], strides = [1, 1]} : vector<8x256xf32> to vector<8x128xf32>
    %18 = arith.addf %17, %16 : vector<8x128xf32>
    %cst_15 = arith.constant 5.000000e-01 : f32
    %19 = vector.broadcast %cst_15 : f32 to vector<8x128xf32>
    %20 = arith.mulf %19, %18 : vector<8x128xf32>
    %cst_16 = arith.constant 0.707106769 : f32
    %21 = vector.broadcast %cst_16 : f32 to vector<8x128xf32>
    %22 = arith.mulf %18, %21 : vector<8x128xf32>
    %23 = math.erf %22 : vector<8x128xf32>
    %cst_17 = arith.constant 1.000000e+00 : f32
    %24 = vector.broadcast %cst_17 : f32 to vector<8x128xf32>
    %25 = arith.addf %24, %23 : vector<8x128xf32>
    %26 = arith.mulf %20, %25 : vector<8x128xf32>
    %cst_18 = arith.constant dense<0.000000e+00> : vector<8x256xf32>
    %27 = tpu.matmul %26, %2, %cst_18 {dimension_numbers = #tpu.dot_dimension_numbers<[1], [0], [0], [1], [0, 0, 1, 1], [], []>} : vector<8x128xf32>, vector<128x256xf32>, vector<8x256xf32> -> vector<8x256xf32>
    %28 = vector.extract_strided_slice %27 {offsets = [0, 0], sizes = [8, 128], strides = [1, 1]} : vector<8x256xf32> to vector<8x128xf32>
    %cst_19 = arith.constant 5.000000e-01 : f32
    %29 = vector.broadcast %cst_19 : f32 to vector<8x128xf32>
    %30 = arith.mulf %29, %28 : vector<8x128xf32>
    %cst_20 = arith.constant 0.707106769 : f32
    %31 = vector.broadcast %cst_20 : f32 to vector<8x128xf32>
    %32 = arith.mulf %28, %31 : vector<8x128xf32>
    %33 = math.erf %32 : vector<8x128xf32>
    %cst_21 = arith.constant 1.000000e+00 : f32
    %34 = vector.broadcast %cst_21 : f32 to vector<8x128xf32>
    %35 = arith.addf %34, %33 : vector<8x128xf32>
    %36 = arith.mulf %30, %35 : vector<8x128xf32>
    %cst_22 = arith.constant dense<0.000000e+00> : vector<8x128xf32>
    %37 = tpu.matmul %0, %36, %cst_22 {dimension_numbers = #tpu.dot_dimension_numbers<[1], [0], [0], [1], [0, 0, 1, 1], [], []>} : vector<8x8xf32>, vector<8x128xf32>, vector<8x128xf32> -> vector<8x128xf32>
    %38 = vector.extract_strided_slice %27 {offsets = [0, 128], sizes = [8, 128], strides = [1, 1]} : vector<8x256xf32> to vector<8x128xf32>
    %39 = arith.addf %38, %37 : vector<8x128xf32>
    %cst_23 = arith.constant 5.000000e-01 : f32
    %40 = vector.broadcast %cst_23 : f32 to vector<8x128xf32>
    %41 = arith.mulf %40, %39 : vector<8x128xf32>
    %cst_24 = arith.constant 0.707106769 : f32
    %42 = vector.broadcast %cst_24 : f32 to vector<8x128xf32>
    %43 = arith.mulf %39, %42 : vector<8x128xf32>
    %44 = math.erf %43 : vector<8x128xf32>
    %cst_25 = arith.constant 1.000000e+00 : f32
    %45 = vector.broadcast %cst_25 : f32 to vector<8x128xf32>
    %46 = arith.addf %45, %44 : vector<8x128xf32>
    %47 = arith.mulf %41, %46 : vector<8x128xf32>
    %cst_26 = arith.constant dense<0.000000e+00> : vector<8x128xf32>
    %48 = tpu.matmul %47, %3, %cst_26 {dimension_numbers = #tpu.dot_dimension_numbers<[1], [0], [0], [1], [0, 0, 1, 1], [], []>} : vector<8x128xf32>, vector<128x128xf32>, vector<8x128xf32> -> vector<8x128xf32>
    %cst_27 = arith.constant 5.000000e-01 : f32
    %49 = vector.broadcast %cst_27 : f32 to vector<8x128xf32>
    %50 = arith.mulf %49, %48 : vector<8x128xf32>
    %cst_28 = arith.constant 0.707106769 : f32
    %51 = vector.broadcast %cst_28 : f32 to vector<8x128xf32>
    %52 = arith.mulf %48, %51 : vector<8x128xf32>
    %53 = math.erf %52 : vector<8x128xf32>
    %cst_29 = arith.constant 1.000000e+00 : f32
    %54 = vector.broadcast %cst_29 : f32 to vector<8x128xf32>
    %55 = arith.addf %54, %53 : vector<8x128xf32>
    %56 = arith.mulf %50, %55 : vector<8x128xf32>
    %cst_30 = arith.constant dense<0.000000e+00> : vector<8xf32>
    %57 = vector.multi_reduction <add>, %56, %cst_30 [1] : vector<8x128xf32> to vector<8xf32>
    %58 = vector.shape_cast %57 : vector<8xf32> to vector<8x1xf32>
    %cst_31 = arith.constant 3.125000e-02 : f32
    %59 = vector.broadcast %cst_31 : f32 to vector<8x1xf32>
    %60 = arith.mulf %58, %59 : vector<8x1xf32>
    %61 = arith.mulf %56, %56 : vector<8x128xf32>
    %cst_32 = arith.constant dense<0.000000e+00> : vector<8xf32>
    %62 = vector.multi_reduction <add>, %61, %cst_32 [1] : vector<8x128xf32> to vector<8xf32>
    %63 = vector.shape_cast %62 : vector<8xf32> to vector<8x1xf32>
    %cst_33 = arith.constant 3.125000e-02 : f32
    %64 = vector.broadcast %cst_33 : f32 to vector<8x1xf32>
    %65 = arith.mulf %63, %64 : vector<8x1xf32>
    %66 = arith.mulf %60, %60 : vector<8x1xf32>
    %67 = arith.subf %65, %66 : vector<8x1xf32>
    %cst_34 = arith.constant 9.99999974E-6 : f32
    %68 = vector.broadcast %cst_34 : f32 to vector<8x1xf32>
    %69 = arith.addf %67, %68 : vector<8x1xf32>
    %70 = math.rsqrt %69 : vector<8x1xf32>
    %71 = vector.broadcast %4 : vector<1x128xf32> to vector<8x128xf32>
    %72 = arith.mulf %56, %71 : vector<8x128xf32>
    %cst_35 = arith.constant dense<0.000000e+00> : vector<8xf32>
    %73 = vector.multi_reduction <add>, %72, %cst_35 [1] : vector<8x128xf32> to vector<8xf32>
    %74 = vector.shape_cast %73 : vector<8xf32> to vector<8x1xf32>
    %75 = vector.shape_cast %4 : vector<1x128xf32> to vector<1x1x128xf32>
    %cst_36 = arith.constant dense<0.000000e+00> : vector<1xf32>
    %76 = vector.multi_reduction <add>, %75, %cst_36 [1, 2] : vector<1x1x128xf32> to vector<1xf32>
    %77 = vector.shape_cast %76 : vector<1xf32> to vector<1x1x1xf32>
    %78 = vector.extract %77[0, 0, 0] : f32 from vector<1x1x1xf32>
    %79 = vector.broadcast %78 : f32 to vector<1x1xf32>
    %80 = vector.shape_cast %5 : vector<1x128xf32> to vector<1x1x128xf32>
    %cst_37 = arith.constant dense<0.000000e+00> : vector<1xf32>
    %81 = vector.multi_reduction <add>, %80, %cst_37 [1, 2] : vector<1x1x128xf32> to vector<1xf32>
    %82 = vector.shape_cast %81 : vector<1xf32> to vector<1x1x1xf32>
    %83 = vector.extract %82[0, 0, 0] : f32 from vector<1x1x1xf32>
    %84 = vector.broadcast %83 : f32 to vector<1x1xf32>
    %85 = vector.broadcast %79 : vector<1x1xf32> to vector<8x1xf32>
    %86 = arith.mulf %60, %85 : vector<8x1xf32>
    %87 = arith.subf %74, %86 : vector<8x1xf32>
    %88 = arith.mulf %70, %87 : vector<8x1xf32>
    %89 = vector.broadcast %84 : vector<1x1xf32> to vector<8x1xf32>
    %90 = arith.addf %88, %89 : vector<8x1xf32>
    %c0_38 = arith.constant 0 : index
    %c0_39 = arith.constant 0 : index
    %91 = vector.load %arg6[%c0_38, %c0_39] : memref<8x1xf32, #tpu.memory_space<vmem>>, vector<8x1xf32>
    tpu.vector_store %arg6[%c0_38, %c0_39], %90 {strides = array<i32>} : memref<8x1xf32, #tpu.memory_space<vmem>>, vector<8x1xf32>,
    return
  }
}

</mosaic_0001>

<bundles_post_ra>
// kernel: tpu_custom_call.1
= control target key start
LH: loop header
LB: loop body
LE: loop exit
PB: predicated region body
PF: predicated region fallthrough
CT: control target
= control target key end

     0   :  { %11 = vsyncpa [#allocation3], 0  ;;  %s1109_s0 = inlined_call_operand.hbm [shape: f32[8,8], index: 0, kind: input, shape index: {}]   ;;  %s1110_s1 = inlined_call_operand.hbm [shape: f32[8,128], index: 1, kind: input, shape index: {}]   ;;  %s1111_s2 = inlined_call_operand.hbm [shape: f32[128,256], index: 2, kind: input, shape index: {}]   ;;  %s1112_s3 = inlined_call_operand.hbm [shape: f32[128,128], index: 3, kind: input, shape index: {}]   ;;  %s1113_s4 = inlined_call_operand.hbm [shape: f32[1,128], index: 4, kind: input, shape index: {}]   ;;  %s1114_s5 = inlined_call_operand.hbm [shape: f32[1,128], index: 5, kind: input, shape index: {}]   ;;  %s1115_s6 = inlined_call_operand.hbm [shape: f32[8,1], index: 6, kind: output, shape index: {}]  }
   0x1   :  { %12 = vsyncpa [#allocation6], 0 }
   0x2   :  { %13 = vsyncpa [#allocation9], 0 }
   0x3   :  { %14 = vsyncpa [#allocation12], 0 }
   0x4   :  { %15 = vsyncpa [#allocation4], 0  ;;  %s950_s21 = smov [#allocation5]   ;;  %s951_s23 = smov [#allocation8]  }
   0x5   :  { %s32_s22 = sshll.u32 %s950_s21, 4  ;;  %s53_s24 = sshll.u32 %s951_s23, 4  ;;  %s33_s22 = int_to_ptr.vmem [resolvable:$true] %s32_s22  ;;  %s999_s24 = int_to_ptr.vmem [resolvable:$true] %s53_s24 }
   0x6   :  { %s786_s27 = scalar_lea.hbm %s1110_s1, 128 }
   0x7   :  { %p787_p0 = scmp.ne.s32.totalorder %s1110_s1, %s786_s27  ;;  %p790_p1 = scmp.lt.u32.totalorder %s786_s27, %s1110_s1 }
   0x9   :  { %p792_p2 = pnand %p790_p1, %p787_p0 }
   0xb   :  { %795 = shalt.err (!%p792_p2)
}
   0xc   :  { %s796_s8 = scalar_lea.vmem %s33_s22, 128  ;;  %p801_p4 = scmp.lt.s32.totalorder %s33_s22, %s33_s22 }
   0xd   :  { %p797_p3 = scmp.ne.s32.totalorder %s33_s22, %s796_s8  ;;  %p802_p5 = scmp.lt.s32.totalorder %s796_s8, %s796_s8 }
   0xf   :  { %p803_p6 = por %p802_p5, %p801_p4 }
  0x11   :  { %p804_p7 = pnand %p803_p6, %p797_p3 }
  0x13   :  { %807 = shalt.err (!%p804_p7)
}
  0x14   :  { %35 = dma.hbm_to_vmem [thread:$0]  %s1110_s1, 128, %s33_s22, [#allocation6]  }
  0x15   :  { %s808_s13 = scalar_lea.hbm %s1112_s3, 2048 }
  0x16   :  { %p809_p8 = scmp.ne.s32.totalorder %s1112_s3, %s808_s13  ;;  %p812_p9 = scmp.lt.u32.totalorder %s808_s13, %s1112_s3 }
  0x18   :  { %p814_p10 = pnand %p812_p9, %p809_p8 }
  0x1a   :  { %817 = shalt.err (!%p814_p10)
}
  0x1b   :  { %s818_s18 = scalar_lea.vmem %s999_s24, 2048  ;;  %p823_p12 = scmp.lt.s32.totalorder %s999_s24, %s999_s24 }
  0x1c   :  { %p819_p11 = scmp.ne.s32.totalorder %s999_s24, %s818_s18  ;;  %p824_p13 = scmp.lt.s32.totalorder %s818_s18, %s818_s18 }
  0x1e   :  { %p825_p0 = por %p824_p13, %p823_p12 }
  0x20   :  { %p826_p1 = pnand %p825_p0, %p819_p11 }
  0x22   :  { %829 = shalt.err (!%p826_p1)
}
  0x23   :  { %s952_s1 = smov 128   ;;  %s953_s19 = smov 8  }
  0x24   :  { %59 = dma.hbm_to_vmem [thread:$0]  %s1112_s3, 2048, %s999_s24, [#allocation9], %s952_s1, %s952_s1, %s953_s19  }
  0x25   :  { %s954_s22 = smov [#allocation2]   ;;  %s955_s25 = smov [#allocation7]  }
  0x26   :  { %s22_s23 = sshll.u32 %s954_s22, 4  ;;  %s41_s26 = sshll.u32 %s955_s25, 4  ;;  %s23_s23 = int_to_ptr.vmem [resolvable:$true] %s22_s23  ;;  %s1030_s26 = int_to_ptr.vmem [resolvable:$true] %s41_s26 }
  0x27   :  { %s830_s29 = scalar_lea.hbm %s1109_s0, 128 }
  0x28   :  { %p831_p2 = scmp.ne.s32.totalorder %s1109_s0, %s830_s29  ;;  %p834_p3 = scmp.lt.u32.totalorder %s830_s29, %s1109_s0 }
  0x2a   :  { %p836_p4 = pnand %p834_p3, %p831_p2 }
  0x2c   :  { %839 = shalt.err (!%p836_p4)
}
  0x2d   :  { %s840_s3 = scalar_lea.vmem %s23_s23, 128  ;;  %p845_p6 = scmp.lt.s32.totalorder %s23_s23, %s23_s23 }
  0x2e   :  { %p841_p5 = scmp.ne.s32.totalorder %s23_s23, %s840_s3  ;;  %p846_p7 = scmp.lt.s32.totalorder %s840_s3, %s840_s3 }
  0x30   :  { %p847_p8 = por %p846_p7, %p845_p6 }
  0x32   :  { %p848_p9 = pnand %p847_p8, %p841_p5 }
  0x34   :  { %851 = shalt.err (!%p848_p9)
}
  0x35   :  { %25 = dma.hbm_to_vmem [thread:$0]  %s1109_s0, 128, %s23_s23, [#allocation3]  }
  0x36   :  { %s852_s13 = scalar_lea.hbm %s1111_s2, 4096 }
  0x37   :  { %p853_p10 = scmp.ne.s32.totalorder %s1111_s2, %s852_s13  ;;  %p856_p11 = scmp.lt.u32.totalorder %s852_s13, %s1111_s2 }
  0x39   :  { %p858_p12 = pnand %p856_p11, %p853_p10 }
  0x3b   :  { %861 = shalt.err (!%p858_p12)
}
  0x3c   :  { %s862_s18 = scalar_lea.vmem %s1030_s26, 4096  ;;  %p867_p0 = scmp.lt.s32.totalorder %s1030_s26, %s1030_s26 }
  0x3d   :  { %p863_p13 = scmp.ne.s32.totalorder %s1030_s26, %s862_s18  ;;  %p868_p1 = scmp.lt.s32.totalorder %s862_s18, %s862_s18 }
  0x3f   :  { %p869_p2 = por %p868_p1, %p867_p0 }
  0x41   :  { %p870_p3 = pnand %p869_p2, %p863_p13 }
  0x43   :  { %873 = shalt.err (!%p870_p3)
}
  0x44   :  { %s956_s0 = smov 256   ;;  %s957_s1 = smov 16  }
  0x45   :  { %47 = dma.hbm_to_vmem [thread:$0]  %s1111_s2, 4096, %s1030_s26, [#allocation6], %s956_s0, %s956_s0, %s957_s1  }
  0x46   :  { %s958_s21 = smov [#allocation10]   ;;  %s959_s23 = smov [#allocation11]  }
  0x47   :  { %s66_s22 = sshll.u32 %s958_s21, 4  ;;  %s76_s25 = sshll.u32 %s959_s23, 4  ;;  %s67_s22 = int_to_ptr.vmem [resolvable:$true] %s66_s22  ;;  %s77_s25 = int_to_ptr.vmem [resolvable:$true] %s76_s25 }
  0x48   :  { %s874_s29 = scalar_lea.hbm %s1113_s4, 16 }
  0x49   :  { %p875_p4 = scmp.ne.s32.totalorder %s1113_s4, %s874_s29  ;;  %p878_p5 = scmp.lt.u32.totalorder %s874_s29, %s1113_s4 }
  0x4b   :  { %p880_p6 = pnand %p878_p5, %p875_p4 }
  0x4d   :  { %883 = shalt.err (!%p880_p6)
}
  0x4e   :  { %s884_s2 = scalar_lea.vmem %s67_s22, 16  ;;  %s888_s26 = scalar_lea.vmem %s67_s22, 32 }
  0x4f   :  { %p885_p7 = scmp.ne.s32.totalorder %s67_s22, %s884_s2  ;;  %p889_p8 = scmp.lt.s32.totalorder %s67_s22, %s67_s22 }
  0x50   :  { %p890_p9 = scmp.lt.s32.totalorder %s888_s26, %s884_s2 }
  0x52   :  { %p891_p10 = por %p890_p9, %p889_p8 }
  0x54   :  { %p892_p11 = pnand %p891_p10, %p885_p7 }
  0x56   :  { %895 = shalt.err (!%p892_p11)
}
  0x57   :  { %69 = dma.hbm_to_vmem [thread:$0]  %s1113_s4, 16, %s67_s22, [#allocation9]  }
  0x58   :  { %s896_s12 = scalar_lea.hbm %s1114_s5, 16 }
  0x59   :  { %p897_p12 = scmp.ne.s32.totalorder %s1114_s5, %s896_s12  ;;  %p900_p13 = scmp.lt.u32.totalorder %s896_s12, %s1114_s5 }
  0x5b   :  { %p902_p0 = pnand %p900_p13, %p897_p12 }
  0x5d   :  { %905 = shalt.err (!%p902_p0)
}
  0x5e   :  { %s906_s17 = scalar_lea.vmem %s77_s25, 16  ;;  %s910_s18 = scalar_lea.vmem %s77_s25, 32 }
  0x5f   :  { %p907_p1 = scmp.ne.s32.totalorder %s77_s25, %s906_s17  ;;  %p911_p2 = scmp.lt.s32.totalorder %s77_s25, %s77_s25 }
  0x60   :  { %p912_p3 = scmp.lt.s32.totalorder %s910_s18, %s906_s17 }
  0x62   :  { %p913_p4 = por %p912_p3, %p911_p2 }
  0x64   :  { %p914_p5 = pnand %p913_p4, %p907_p1 }
  0x66   :  { %917 = shalt.err (!%p914_p5)
}
  0x67   :  { %79 = dma.hbm_to_vmem [thread:$0]  %s1114_s5, 16, %s77_s25, [#allocation12]  }
  0x68   :  { %940 = dma.done.wait [#allocation3], 128  }
  0x69   :  { %941 = vsyncadd [#allocation3], 4294967168 }
  0x6a   :  { %942 = dma.done.wait [#allocation6], 4224  }
  0x6b   :  { %943 = vsyncadd [#allocation6], 4294963072 }
  0x6c   :  { %944 = dma.done.wait [#allocation9], 2064  }
  0x6d   :  { %945 = vsyncadd [#allocation9], 4294965232 }
  0x6e   :  { %946 = dma.done.wait [#allocation12], 16  }
  0x6f   :  { %947 = vsyncadd [#allocation12], 4294967280  ;;  %v960_v0 = vmov 0.0   ;;  %v101_v1 = vld [vmem:[#allocation7 + $0x8] sm:$0xff]  ;;  %v103_v2 = vld [vmem:[#allocation7 + $0x18] sm:$0xff]  ;;  %vm961_vm0 = vmmov 0  }
  0x70   :  { %214 = vmatprep.mubr.f32.mxu0 %v960_v0  ;;  %370 = vmatprep.mubr.f32.mxu1 %v960_v0  ;;  %v100_v3 = vld [vmem:[#allocation7] sm:$0xff]  ;;  %v668_v4 = vpack.c.bf16 %v103_v2, %v101_v1  ;;  %v102_v5 = vld [vmem:[#allocation7 + $0x10] sm:$0xff]  ;;  %v105_v6 = vld [vmem:[#allocation7 + $0x28] sm:$0xff]  ;;  %vm226_vm1 = vcmask 64512   ;;  %vm553_vm2 = vcmask 1040384   ;;  %s963_s19 = smov [#allocation13]  }
  0x71   :  { %v107_v7 = vld [vmem:[#allocation7 + $0x38] sm:$0xff]  ;;  %v670_v8 = vpack.c.bf16 %v102_v5, %v100_v3  ;;  %v104_v10 = vld [vmem:[#allocation7 + $0x20] sm:$0xff]  ;;  %v106_v11 = vld [vmem:[#allocation7 + $0x30] sm:$0xff]  ;;  %s588_s20 = sshll.u32 %s963_s19, 4  ;;  %vm580_vm3 = vcmask 7168   ;;  %s589_s20 = int_to_ptr.vmem [resolvable:$true] %s588_s20 }
  0x72   :  { %v672_v9 = vpack.c.bf16 %v107_v7, %v105_v6  ;;  %v109_v12 = vld [vmem:[#allocation7 + $0x48] sm:$0xff]  ;;  %669 = vmatprep.subr.bf16.mxu0 %v668_v4  ;;  %v111_v13 = vld [vmem:[#allocation7 + $0x58] sm:$0xff]  ;;  %701 = vmatprep.subr.bf16.mxu1 %v668_v4  ;;  %v674_v14 = vpack.c.bf16 %v106_v11, %v104_v10  ;;  %v108_v16 = vld [vmem:[#allocation7 + $0x40] sm:$0xff]  ;;  %v962_v6 = vmov 0.0|0.0   ;;  %s918_s21 = scalar_lea.vmem %s589_s20, 128  ;;  %p923_p7 = scmp.lt.s32.totalorder %s589_s20, %s589_s20 }
  0x73   :  { %671 = vmatpush1.bf16.msra.mxu0 %v670_v8  ;;  %703 = vmatpush1.bf16.msra.mxu1 %v670_v8  ;;  %v676_v15 = vpack.c.bf16 %v111_v13, %v109_v12  ;;  %v110_v17 = vld [vmem:[#allocation7 + $0x50] sm:$0xff]  ;;  %v113_v18 = vld [vmem:[#allocation7 + $0x68] sm:$0xff]  ;;  %v115_v19 = vld [vmem:[#allocation7 + $0x78] sm:$0xff]  ;;  %p919_p6 = scmp.ne.s32.totalorder %s589_s20, %s918_s21  ;;  %p924_p8 = scmp.lt.s32.totalorder %s918_s21, %s918_s21 }
  0x74   :  { %673 = vmatprep.subr.bf16.mxu0 %v672_v9  ;;  %705 = vmatprep.subr.bf16.mxu1 %v672_v9  ;;  %v678_v20 = vpack.c.bf16 %v110_v17, %v108_v16  ;;  %v680_v21 = vpack.c.bf16 %v115_v19, %v113_v18  ;;  %v112_v22 = vld [vmem:[#allocation7 + $0x60] sm:$0xff]  ;;  %v114_v23 = vld [vmem:[#allocation7 + $0x70] sm:$0xff]  ;;  %v117_v24 = vld [vmem:[#allocation7 + $0x88] sm:$0xff] }
  0x75   :  { %v119_v25 = vld [vmem:[#allocation7 + $0x98] sm:$0xff]  ;;  %v682_v26 = vpack.c.bf16 %v114_v23, %v112_v22  ;;  %v116_v28 = vld [vmem:[#allocation7 + $0x80] sm:$0xff]  ;;  %v118_v29 = vld [vmem:[#allocation7 + $0x90] sm:$0xff]  ;;  %p925_p9 = por %p924_p8, %p923_p7 }
  0x76   :  { %v684_v27 = vpack.c.bf16 %v119_v25, %v117_v24  ;;  %v121_v30 = vld [vmem:[#allocation7 + $0xa8] sm:$0xff]  ;;  %v123_v31 = vld [vmem:[#allocation7 + $0xb8] sm:$0xff]  ;;  %v686_v32 = vpack.c.bf16 %v118_v29, %v116_v28  ;;  %v120_v34 = vld [vmem:[#allocation7 + $0xa0] sm:$0xff] }
  0x77   :  { %675 = vmatpush1.bf16.msra.mxu0 %v674_v14  ;;  %707 = vmatpush1.bf16.msra.mxu1 %v674_v14  ;;  %v688_v33 = vpack.c.bf16 %v123_v31, %v121_v30  ;;  %v122_v35 = vld [vmem:[#allocation7 + $0xb0] sm:$0xff]  ;;  %v125_v36 = vld [vmem:[#allocation7 + $0xc8] sm:$0xff]  ;;  %v127_v37 = vld [vmem:[#allocation7 + $0xd8] sm:$0xff]  ;;  %p926_p10 = pnand %p925_p9, %p919_p6 }
  0x78   :  { %677 = vmatprep.subr.bf16.mxu0 %v676_v15  ;;  %709 = vmatprep.subr.bf16.mxu1 %v676_v15  ;;  %v690_v38 = vpack.c.bf16 %v122_v35, %v120_v34  ;;  %v692_v39 = vpack.c.bf16 %v127_v37, %v125_v36  ;;  %v124_v40 = vld [vmem:[#allocation7 + $0xc0] sm:$0xff]  ;;  %v126_v41 = vld [vmem:[#allocation7 + $0xd0] sm:$0xff]  ;;  %v129_v42 = vld [vmem:[#allocation7 + $0xe8] sm:$0xff] }
  0x79   :  { %v131_v43 = vld [vmem:[#allocation7 + $0xf8] sm:$0xff]  ;;  %v694_v44 = vpack.c.bf16 %v126_v41, %v124_v40  ;;  %v128_v46 = vld [vmem:[#allocation7 + $0xe0] sm:$0xff]  ;;  %v130_v47 = vld [vmem:[#allocation7 + $0xf0] sm:$0xff] }
  0x7a   :  { %v696_v45 = vpack.c.bf16 %v131_v43, %v129_v42  ;;  %v698_v48 = vpack.c.bf16 %v130_v47, %v128_v46  ;;  %v99_v49 = vld [vmem:[#allocation5] sm:$0xff]  ;;  %v98_v57 = vld [vmem:[#allocation2] sm:$0xff]  ;;  %v132_v3 = vld [vmem:[#allocation8] sm:$0xff] }
  0x7b   :  { %679 = vmatpush1.bf16.msra.mxu0 %v678_v20  ;;  %711 = vmatpush1.bf16.msra.mxu1 %v678_v20  ;;  %v133_v4 = vld [vmem:[#allocation8 + $0x8] sm:$0xff]  ;;  %v134_v5 = vld [vmem:[#allocation8 + $0x10] sm:$0xff]  ;;  %v135_v8 = vld [vmem:[#allocation8 + $0x18] sm:$0xff] }
  0x7c   :  { %681 = vmatprep.subr.bf16.mxu0 %v680_v21  ;;  %713 = vmatprep.subr.bf16.mxu1 %v680_v21  ;;  %v733_v7 = vpack.c.bf16 %v133_v4, %v132_v3  ;;  %v736_v9 = vpack.c.bf16 %v135_v8, %v134_v5  ;;  %v136_v10 = vld [vmem:[#allocation8 + $0x20] sm:$0xff]  ;;  %v137_v11 = vld [vmem:[#allocation8 + $0x28] sm:$0xff]  ;;  %v138_v19 = vld [vmem:[#allocation8 + $0x30] sm:$0xff] }
  0x7d   :  { %v739_v12 = vpack.c.bf16 %v137_v11, %v136_v10  ;;  %v139_v20 = vld [vmem:[#allocation8 + $0x38] sm:$0xff]  ;;  %v140_v22 = vld [vmem:[#allocation8 + $0x40] sm:$0xff]  ;;  %v141_v23 = vld [vmem:[#allocation8 + $0x48] sm:$0xff] }
  0x7e   :  { %v742_v21 = vpack.c.bf16 %v139_v20, %v138_v19  ;;  %v745_v24 = vpack.c.bf16 %v141_v23, %v140_v22  ;;  %v142_v25 = vld [vmem:[#allocation8 + $0x50] sm:$0xff]  ;;  %v144_v28 = vld [vmem:[#allocation8 + $0x60] sm:$0xff]  ;;  %v145_v29 = vld [vmem:[#allocation8 + $0x68] sm:$0xff] }
  0x7f   :  { %683 = vmatpush1.bf16.msra.mxu0 %v682_v26  ;;  %715 = vmatpush1.bf16.msra.mxu1 %v682_v26  ;;  %v143_v26 = vld [vmem:[#allocation8 + $0x58] sm:$0xff]  ;;  %v751_v30 = vpack.c.bf16 %v145_v29, %v144_v28  ;;  %v146_v31 = vld [vmem:[#allocation8 + $0x70] sm:$0xff]  ;;  %v148_v34 = vld [vmem:[#allocation10] sm:$0x1] }
  0x80   :  { %685 = vmatprep.subr.bf16.mxu0 %v684_v27  ;;  %717 = vmatprep.subr.bf16.mxu1 %v684_v27  ;;  %v748_v27 = vpack.c.bf16 %v143_v26, %v142_v25  ;;  %v149_v35 = vld [vmem:[#allocation11] sm:$0x1]  ;;  %v554_v36 = vsel %vm553_vm2, %v148_v34, 0.0 }
  0x81   :  { %555 = vadd.xlane.f32.xlu0 %v554_v36  ;;  %v564_v37 = vsel %vm553_vm2, %v149_v35, 0.0 }
  0x83   :  { %687 = vmatpush1.bf16.msra.mxu0 %v686_v32  ;;  %719 = vmatpush1.bf16.msra.mxu1 %v686_v32  ;;  %v147_v32 = vld [vmem:[#allocation8 + $0x78] sm:$0xff] }
  0x84   :  { %689 = vmatprep.subr.bf16.mxu0 %v688_v33  ;;  %721 = vmatprep.subr.bf16.mxu1 %v688_v33  ;;  %v754_v33 = vpack.c.bf16 %v147_v32, %v146_v31 }
  0x85   :  { %565 = vadd.xlane.f32.xlu0 %v564_v37 }
  0x87   :  { %691 = vmatpush1.bf16.msra.mxu0 %v690_v38  ;;  %723 = vmatpush1.bf16.msra.mxu1 %v690_v38 }
  0x88   :  { %693 = vmatprep.subr.bf16.mxu0 %v692_v39  ;;  %725 = vmatprep.subr.bf16.mxu1 %v692_v39 }
  0x8b   :  { %695 = vmatpush1.bf16.msra.mxu0 %v694_v44  ;;  %727 = vmatpush1.bf16.msra.mxu1 %v694_v44 }
  0x8c   :  { %697 = vmatprep.subr.bf16.mxu0 %v696_v45  ;;  %729 = vmatprep.subr.bf16.mxu1 %v696_v45 }
  0x8f   :  { %699 = vmatpush1.bf16.msra.mxu0 %v698_v48  ;;  %731 = vmatpush1.bf16.msra.mxu1 %v698_v48 }
  0x90   :  { %623 = vmatprep.subr.mxu0 %v960_v0  ;;  %732 = vmatprep.subr.bf16.mxu1 %v962_v6 }
  0x92   :  { %215 = vmatmul.mubr.f32.vlgmr.msra.gmra.mrb[0].mxu0 %v99_v49 }
  0x93   :  { %625 = vmatprep.mubr.msk.f32.mxu0 %vm961_vm0, %v960_v0 }
 0x10e   :  { %v556_v46 = vpop.xlane.xlu0 %555 }
 0x10f   :  { %v557_v47 = vrot.slane %v556_v46, 4 }
 0x111   :  { %v558_v48 = vadd.f32 %v557_v47, %v556_v46 }
 0x112   :  { %v566_v49 = vpop.xlane.xlu0 %565 }
 0x165   :  { %v216_v50 = vpop.f32.mrb[0].mxu0 }
 0x166   :  { %v222_v51 = vmul.f32 0.70710677, %v216_v50  ;;  %v218_v52 = vpop.f32.mrb[1].mxu0  ;;  %v221_v54 = vmul.f32 0.5, %v216_v50  ;;  %v559_v50 = vrot.slane %v558_v48, 2 }
 0x168   :  { %774 = verf.f32 %v222_v51  ;;  %v567_v51 = vrot.slane %v566_v49, 4 }
 0x172   :  { %v775_v53 = vpop.eup %774 }
 0x173   :  { %v224_v55 = vadd.f32 1.0, %v775_v53  ;;  %v568_v53 = vadd.f32 %v567_v51, %v566_v49 }
 0x175   :  { %v225_v56 = vmul.f32 %v224_v55, %v221_v54  ;;  %v569_v55 = vrot.slane %v568_v53, 2 }
 0x177   :  { %624 = vmatpush3.msra.mxu0 %v225_v56 }
 0x178   :  { %626 = vmatmul.mubr.msk.f32.vlgmr.msra.gmra.mrb[2].mxu0 %vm226_vm1, %v98_v57  ;;  %628 = vmatprep.subr.mxu0 %v960_v0 }
 0x179   :  { %630 = vmatprep.mubr.msk.f32.mxu0 %vm961_vm0, %v960_v0 }
 0x24b   :  { %v296_v58 = vpop.f32.mrb[2].mxu0 }
 0x24c   :  { %v300_v59 = vadd.f32 %v296_v58, %v218_v52  ;;  %v627_v60 = vpop.f32.mrb[3].mxu0  ;;  %v560_v52 = vadd.f32 %v559_v50, %v558_v48 }
 0x24e   :  { %v302_v61 = vmul.f32 0.70710677, %v300_v59  ;;  %v301_v63 = vmul.f32 0.5, %v300_v59  ;;  %v561_v54 = vrot.slane %v560_v52, 1 }
 0x250   :  { %776 = verf.f32 %v302_v61  ;;  %v562_v56 = vadd.f32 %v561_v54, %v560_v52 }
 0x252   :  { %756 = vpush %v562_v56 }
 0x25a   :  { %v777_v62 = vpop.eup %776 }
 0x25b   :  { %v304_v1 = vadd.f32 1.0, %v777_v62 }
 0x25d   :  { %v305_v2 = vmul.f32 %v304_v1, %v301_v63  ;;  %v545_v63 = vlaneseq }
 0x25f   :  { %371 = vmatmul.mubr.f32.vlgmr.msra.gmra.mrb[0].mxu1 %v305_v2  ;;  %v546_v1 = vshrl.u32 %v545_v63, 7 }
 0x260   :  { %665 = vmatprep.mubr.msk.f32.mxu1 %vm961_vm0, %v960_v0  ;;  %734 = vmatpush3.bf16.msra.mxu1 %v733_v7 }
 0x261   :  { %735 = vmatprep.subr.bf16.mxu1 %v962_v6  ;;  %v547_v2 = vsub.s32 0, %v546_v1 }
 0x263   :  { %v548_v4 = vrot.slane %v148_v34, %v547_v2 }
 0x264   :  { %737 = vmatpush3.bf16.msra.mxu1 %v736_v9 }
 0x265   :  { %738 = vmatprep.subr.bf16.mxu1 %v962_v6 }
 0x268   :  { %740 = vmatpush3.bf16.msra.mxu1 %v739_v12 }
 0x269   :  { %741 = vmatprep.subr.bf16.mxu1 %v962_v6 }
 0x26c   :  { %743 = vmatpush3.bf16.msra.mxu1 %v742_v21 }
 0x26d   :  { %744 = vmatprep.subr.bf16.mxu1 %v962_v6 }
 0x270   :  { %746 = vmatpush3.bf16.msra.mxu1 %v745_v24 }
 0x271   :  { %747 = vmatprep.subr.bf16.mxu1 %v962_v6 }
 0x274   :  { %749 = vmatpush3.bf16.msra.mxu1 %v748_v27 }
 0x275   :  { %750 = vmatprep.subr.bf16.mxu1 %v962_v6 }
 0x278   :  { %752 = vmatpush3.bf16.msra.mxu1 %v751_v30 }
 0x279   :  { %753 = vmatprep.subr.bf16.mxu1 %v962_v6 }
 0x27c   :  { %755 = vmatpush3.bf16.msra.mxu1 %v754_v33 }
 0x283   :  { %s757_s5 = spop %756 }
 0x332   :  { %v372_v13 = vpop.f32.mrb[0].mxu1 }
 0x333   :  { %v378_v14 = vmul.f32 0.70710677, %v372_v13  ;;  %v374_v0 = vpop.f32.mrb[1].mxu1  ;;  %v377_v16 = vmul.f32 0.5, %v372_v13 }
 0x335   :  { %778 = verf.f32 %v378_v14 }
 0x33f   :  { %v779_v15 = vpop.eup %778 }
 0x340   :  { %v380_v17 = vadd.f32 1.0, %v779_v15 }
 0x342   :  { %v381_v18 = vmul.f32 %v380_v17, %v377_v16  ;;  %v574_v16 = vstv %s757_s5 }
 0x344   :  { %629 = vmatpush3.msra.mxu0 %v381_v18 }
 0x345   :  { %631 = vmatmul.mubr.msk.f32.vlgmr.msra.gmra.mrb[4].mxu0 %vm226_vm1, %v98_v57  ;;  %v570_v57 = vadd.f32 %v569_v55, %v568_v53 }
 0x347   :  { %v571_v58 = vrot.slane %v570_v57, 1 }
 0x349   :  { %v572_v59 = vadd.f32 %v571_v58, %v570_v57 }
 0x34b   :  { %758 = vpush %v572_v59 }
 0x37c   :  { %s759_s1 = spop %758 }
 0x37d   :  { %v578_v22 = vstv %s759_s1 }
 0x418   :  { %v448_v38 = vpop.f32.mrb[4].mxu0 }
 0x419   :  { %v452_v39 = vadd.f32 %v448_v38, %v374_v0  ;;  %v632_v40 = vpop.f32.mrb[5].mxu0 }
 0x41b   :  { %v454_v41 = vmul.f32 0.70710677, %v452_v39  ;;  %v453_v43 = vmul.f32 0.5, %v452_v39 }
 0x41d   :  { %780 = verf.f32 %v454_v41 }
 0x427   :  { %v781_v42 = vpop.eup %780 }
 0x428   :  { %v456_v44 = vadd.f32 1.0, %v781_v42 }
 0x42a   :  { %v457_v45 = vmul.f32 %v456_v44, %v453_v43 }
 0x42c   :  { %666 = vmatmul.mubr.f32.vlgmr.msra.gmra.mrb[2].mxu1 %v457_v45 }
 0x4ff   :  { %v524_v60 = vpop.f32.mrb[2].mxu1 }
 0x500   :  { %v529_v61 = vmul.f32 0.70710677, %v524_v60  ;;  %v667_v62 = vpop.f32.mrb[3].mxu1  ;;  %v528_v5 = vmul.f32 0.5, %v524_v60 }
 0x502   :  { %782 = verf.f32 %v529_v61 }
 0x50c   :  { %v783_v3 = vpop.eup %782 }
 0x50d   :  { %v531_v6 = vadd.f32 1.0, %v783_v3 }
 0x50f   :  { %v532_v7 = vmul.f32 %v531_v6, %v528_v5 }
 0x511   :  { %533 = vadd.xlane.f32.xlu1 %v532_v7  ;;  %v550_v8 = vmul.f32 %v548_v4, %v532_v7  ;;  %v536_v9 = vmul.f32 %v532_v7, %v532_v7 }
 0x513   :  { %551 = vadd.xlane.f32.xlu0 %v550_v8 }
 0x515   :  { %537 = vadd.xlane.f32.xlu1 %v536_v9 }
 0x59e   :  { %v534_v10 = vpop.xlane.xlu1 %533 }
 0x59f   :  { %v535_v11 = vmul.f32 0.03125, %v534_v10 }
 0x5a0   :  { %v552_v18 = vpop.xlane.xlu0 %551 }
 0x5a1   :  { %v540_v13 = vmul.f32 %v535_v11, %v535_v11  ;;  %v575_v17 = vmul.f32 %v574_v16, %v535_v11 }
 0x5a2   :  { %v538_v12 = vpop.xlane.xlu1 %537 }
 0x5a3   :  { %v539_v14 = vmul.f32 0.03125, %v538_v12  ;;  %v576_v19 = vsub.f32 %v552_v18, %v575_v17 }
 0x5a5   :  { %v541_v0 = vsub.f32 %v539_v14, %v540_v13 }
 0x5a7   :  { %v542_v15 = vadd.f32 1e-05, %v541_v0 }
 0x5a9   :  { %784 = vrsqrt.f32 %v542_v15 }
 0x5b3   :  { %v785_v20 = vpop.eup %784 }
 0x5b4   :  { %v577_v21 = vmul.f32 %v785_v20, %v576_v19 }
 0x5b6   :  { %v579_v23 = vadd.f32 %v578_v22, %v577_v21 }
 0x5b8   :  { %581 = vst.msk [vmem:[#allocation13] sm:$0xff] %vm580_vm3, %v579_v23 }
 0x5b9   :  { %929 = shalt.err (!%p926_p10)
}
 0x5ba   :  { %s930_s25 = scalar_lea.hbm %s1115_s6, 128 }
 0x5bb   :  { %p931_p11 = scmp.ne.s32.totalorder %s1115_s6, %s930_s25  ;;  %p934_p12 = scmp.lt.u32.totalorder %s930_s25, %s1115_s6 }
 0x5bd   :  { %p936_p13 = pnand %p934_p12, %p931_p11 }
 0x5bf   :  { %939 = shalt.err (!%p936_p13)
}
 0x5c0   :  { %591 = dma.vmem_to_hbm [thread:$0]  %s589_s20, 128, %s1115_s6, [#allocation4]  }
 0x5c1   :  { %948 = dma.done.wait [#allocation4], 128  }
 0x5c2   :  { %949 = vsyncadd [#allocation4], 4294967168 }
 0x5c3   :  { %595 = vsyncpa [#allocation3], 1 }
 0x5c4   :  { %596 = vsyncpa [#allocation6], 1 }
 0x5c5   :  { %597 = vsyncpa [#allocation9], 1 }
 0x5c6   :  { %598 = vsyncpa [#allocation12], 1 }
 0x5c7   :  { %599 = vsyncpa [#allocation4], 1 }

</bundles_post_ra>
